<compile_context>
chip_gen: v7x
topology: tpu7x:2x2x1
jax: 0.10.0
libtpu: 0.0.40
codegen_flags: <defaults>
</compile_context>

<pallas_src>
import math

import jax
import jax.numpy as jnp
from jax.experimental import pallas as pl
from jax.experimental.pallas import tpu as pltpu

HIDDEN_SIZE = 512
N_CLASSES = 2
_LANE = 128


def _round_up(x, m):
    return ((x + m - 1) // m) * m


def _vmem_capacity_bytes():
    try:
        return int(pltpu.get_tpu_info().vmem_capacity_bytes)
    except Exception:
        return 64 * 1024 * 1024  # assume the smallest generation (v7x) if query fails


def _vmem_limit_bytes():
    # Never request the whole physical VMEM (v7x only has 64 MiB).
    return (3 * _vmem_capacity_bytes()) // 4


def _choose_batch_tile(B, F, H=HIDDEN_SIZE, C=N_CLASSES):
    """Batch tile (multiple of 8) fitting a conservative VMEM budget, with >=2 grid steps."""
    budget = (3 * _vmem_capacity_bytes()) // 8  # ~24 MiB on v7x, ~48 MiB on v5e/v6e
    # VMEM-resident operands (BlockSpec keeps 2 buffers per input).
    resident = 2 * (F * H * 2) + 2 * (C * H * 4) + 2 * (H * 4) + 2 * (C * 4)
    # Per-batch-row cost: 2 f32 x buffers, 2 lane-padded f32 out buffers,
    # ~3 live (bt, H) f32 intermediates (fc1 acc, relu'd h, per-class product),
    # plus the in-kernel bf16 copy of x.
    per_row = 2 * F * 4 + 2 * _LANE * 4 + 3 * H * 4 + F * 2
    avail = max(budget - resident, per_row * 8)
    tile = avail // per_row
    # Guarantee >=2 grid steps so both v7x TensorCores get sharded work.
    tile = min(tile, _round_up(-(-B // 2), 8))
    tile = max(8, min(int(tile), 4096))
    return (tile // 8) * 8


def _mlp_kernel(x_ref, w1_ref, b1_ref, w2t_ref, b2_ref, o_ref):
    # fc1 on the MXU: in-kernel bf16 cast of x (VPU work, hidden under the MXU),
    # f32 accumulation.
    x = x_ref[...].astype(jnp.bfloat16)
    h = jnp.dot(x, w1_ref[...], preferred_element_type=jnp.float32)
    # Bias + ReLU on the f32 accumulator (v5e VPU has no bf16).
    h = jnp.maximum(h + b1_ref[...], 0.0)

    # fc3 (H -> C=2) off the MXU: per-class broadcast-multiply + lane reduction
    # on the VPU/XLU, keeping h in f32 (halves the MXU pushes, no bf16 downcast).
    bt = h.shape[0]
    n_classes = o_ref.shape[-1]
    w2t = w2t_ref[...]                                              # (C, H) f32
    lane = jax.lax.broadcasted_iota(jnp.int32, (bt, n_classes), 1)
    out = jnp.zeros((bt, n_classes), jnp.float32)
    for c in range(n_classes):                                      # static unroll (C == 2)
        col = jnp.sum(h * w2t[c:c + 1, :], axis=-1, keepdims=True)  # (bt, 1)
        out = jnp.where(lane == c, col, out)
    o_ref[...] = (out + b2_ref[...]).astype(o_ref.dtype)


def net_forward(x, w1, b1, w2, b2, *, batch_tile=None):
    """x: (B, n_features) f32; w1: (F, H); b1: (1, H); w2: (H, C); b2: (1, C)."""
    B, F = x.shape
    H = w1.shape[1]
    C = w2.shape[1]

    # W1 in bf16 for the MXU; W2 transposed to (C, H) and kept f32 for the VPU
    # fc3 path; biases f32 for the f32 epilogue.
    w1_bf = w1.astype(jnp.bfloat16)
    w2_t = jnp.transpose(w2.astype(jnp.float32))     # (C, H)
    b1_f = b1.astype(jnp.float32).reshape(1, H)
    b2_f = b2.astype(jnp.float32).reshape(1, C)
    x_f = x.astype(jnp.float32)                      # bf16 cast happens in-kernel

    if batch_tile is None:
        bt = _choose_batch_tile(B, F, H, C)
    else:
        bt = max(8, (min(int(batch_tile), _round_up(B, 8)) // 8) * 8)

    # Ragged batch handled by a partial last block (masked writeback); no pad copy.
    grid = (pl.cdiv(B, bt),)

    out = pl.pallas_call(
        _mlp_kernel,
        out_shape=jax.ShapeDtypeStruct((B, C), jnp.float32),
        grid=grid,
        in_specs=[
            pl.BlockSpec((bt, F), lambda i: (i, 0)),   # x: streamed f32 per tile
            pl.BlockSpec((F, H), lambda i: (0, 0)),    # W1 (bf16): VMEM-resident
            pl.BlockSpec((1, H), lambda i: (0, 0)),    # b1 (f32): VMEM-resident
            pl.BlockSpec((C, H), lambda i: (0, 0)),    # W2^T (f32): VMEM-resident
            pl.BlockSpec((1, C), lambda i: (0, 0)),    # b2 (f32): VMEM-resident
        ],
        out_specs=pl.BlockSpec((bt, C), lambda i: (i, 0)),
        compiler_params=pltpu.CompilerParams(
            dimension_semantics=("parallel",),
            vmem_limit_bytes=_vmem_limit_bytes(),
        ),
    )(x_f, w1_bf, b1_f, w2_t, b2_f)

    return out


def init_params(key, n_features):
    """Deterministic init mimicking nn.Linear default (uniform +- 1/sqrt(fan_in))."""
    k1, k2, k3, k4 = jax.random.split(key, 4)
    bound1 = 1.0 / math.sqrt(n_features)
    bound2 = 1.0 / math.sqrt(HIDDEN_SIZE)
    # Stored as (in, out) so the math is x @ W (== x @ W_pt.T).
    w1 = jax.random.uniform(k1, (n_features, HIDDEN_SIZE), jnp.float32,
                            -bound1, bound1)
    b1 = jax.random.uniform(k2, (1, HIDDEN_SIZE), jnp.float32, -bound1, bound1)
    w2 = jax.random.uniform(k3, (HIDDEN_SIZE, N_CLASSES), jnp.float32,
                            -bound2, bound2)
    b2 = jax.random.uniform(k4, (1, N_CLASSES), jnp.float32, -bound2, bound2)
    return w1, b1, w2, b2


def _ref_forward(x, w1, b1, w2, b2):
    # Plain-JAX reference (f32 throughout, same math as the PyTorch module).
    return jnp.maximum(x @ w1 + b1, 0.0) @ w2 + b2


if __name__ == "__main__":
    key = jax.random.PRNGKey(0)
    n_features = 32

    kx, kp, kx2 = jax.random.split(key, 3)
    w1, b1, w2, b2 = init_params(kp, n_features)

    # Small single-tile case.
    batch = 8
    x = jax.random.normal(kx, (batch, n_features), jnp.float32)
    out = net_forward(x, w1, b1, w2, b2)
    jax.block_until_ready(out)
    ref = _ref_forward(x, w1, b1, w2, b2)
    assert out.shape == (batch, N_CLASSES)
    # bf16 fc1 inputs -> loosen tolerance vs the f32 reference (fc3 is f32 now).
    assert jnp.allclose(out, ref, atol=2e-2, rtol=2e-2)

    # Multi-tile case exercising the batch grid + partial last block (200 % 64 != 0).
    batch2 = 200
    x2 = jax.random.normal(kx2, (batch2, n_features), jnp.float32)
    out2 = net_forward(x2, w1, b1, w2, b2, batch_tile=64)
    jax.block_until_ready(out2)
    ref2 = _ref_forward(x2, w1, b1, w2, b2)
    assert out2.shape == (batch2, N_CLASSES)
    assert jnp.allclose(out2, ref2, atol=2e-2, rtol=2e-2)

    # Default tile path (auto-sized, >=2 grid steps).
    out3 = net_forward(x2, w1, b1, w2, b2)
    jax.block_until_ready(out3)
    assert jnp.allclose(out3, ref2, atol=2e-2, rtol=2e-2)

    print("KERNEL_OK")
</pallas_src>

<mosaic_0001>
module attributes {stable_mosaic.version = 11 : i64} {
  func.func @_mlp_kernel(%arg0: i32, %arg1: memref<8x32xf32, #tpu.memory_space<vmem>>, %arg2: memref<32x512xbf16, #tpu.memory_space<vmem>>, %arg3: memref<1x512xf32, #tpu.memory_space<vmem>>, %arg4: memref<2x512xf32, #tpu.memory_space<vmem>>, %arg5: memref<1x2xf32, #tpu.memory_space<vmem>>, %arg6: memref<8x2xf32, #tpu.memory_space<vmem>>) attributes {dimension_semantics = [#tpu.dimension_semantics<parallel>], iteration_bounds = array<i64: 1>, scalar_prefetch = 0 : i64, scratch_operands = 0 : i64, tpu.core_type = #tpu.core_type<tc>, window_params = [{transform_indices = @transform_0, window_bounds = array<i64: 8, 32>}, {pipeline_mode = #tpu.pipeline_mode<synchronous>, transform_indices = @transform_1, window_bounds = array<i64: 32, 512>}, {pipeline_mode = #tpu.pipeline_mode<synchronous>, transform_indices = @transform_2, window_bounds = array<i64: 1, 512>}, {pipeline_mode = #tpu.pipeline_mode<synchronous>, transform_indices = @transform_3, window_bounds = array<i64: 2, 512>}, {pipeline_mode = #tpu.pipeline_mode<synchronous>, transform_indices = @transform_4, window_bounds = array<i64: 1, 2>}, {transform_indices = @transform_5, window_bounds = array<i64: 8, 2>}]} {
    %c0 = arith.constant 0 : index
    %c0_0 = arith.constant 0 : index
    %0 = vector.load %arg1[%c0, %c0_0] : memref<8x32xf32, #tpu.memory_space<vmem>>, vector<8x32xf32>
    %1 = arith.truncf %0 : vector<8x32xf32> to vector<8x32xbf16>
    %c0_1 = arith.constant 0 : index
    %c0_2 = arith.constant 0 : index
    %2 = vector.load %arg2[%c0_1, %c0_2] : memref<32x512xbf16, #tpu.memory_space<vmem>>, vector<32x512xbf16>
    %cst = arith.constant dense<0.000000e+00> : vector<8x512xf32>
    %3 = tpu.matmul %1, %2, %cst {dimension_numbers = #tpu.dot_dimension_numbers<[1], [0], [0], [1], [0, 0, 1, 1], [], []>} : vector<8x32xbf16>, vector<32x512xbf16>, vector<8x512xf32> -> vector<8x512xf32>
    %c0_3 = arith.constant 0 : index
    %c0_4 = arith.constant 0 : index
    %4 = vector.load %arg3[%c0_3, %c0_4] : memref<1x512xf32, #tpu.memory_space<vmem>>, vector<1x512xf32>
    %5 = vector.broadcast %4 : vector<1x512xf32> to vector<8x512xf32>
    %6 = arith.addf %3, %5 : vector<8x512xf32>
    %cst_5 = arith.constant 0.000000e+00 : f32
    %7 = vector.broadcast %cst_5 : f32 to vector<8x512xf32>
    %8 = arith.maximumf %6, %7 : vector<8x512xf32>
    %c0_6 = arith.constant 0 : index
    %c0_7 = arith.constant 0 : index
    %9 = vector.load %arg4[%c0_6, %c0_7] : memref<2x512xf32, #tpu.memory_space<vmem>>, vector<2x512xf32>
    %10 = tpu.iota {dimensions = array<i32: 1>} : vector<8x2xi32>
    %cst_8 = arith.constant 0.000000e+00 : f32
    %11 = vector.broadcast %cst_8 : f32 to vector<8x2xf32>
    %12 = vector.extract_strided_slice %9 {offsets = [0, 0], sizes = [1, 512], strides = [1, 1]} : vector<2x512xf32> to vector<1x512xf32>
    %13 = vector.broadcast %12 : vector<1x512xf32> to vector<8x512xf32>
    %14 = arith.mulf %8, %13 : vector<8x512xf32>
    %cst_9 = arith.constant dense<0.000000e+00> : vector<8xf32>
    %15 = vector.multi_reduction <add>, %14, %cst_9 [1] : vector<8x512xf32> to vector<8xf32>
    %16 = vector.shape_cast %15 : vector<8xf32> to vector<8x1xf32>
    %c0_i32 = arith.constant 0 : i32
    %17 = vector.broadcast %c0_i32 : i32 to vector<8x2xi32>
    %18 = arith.cmpi eq, %10, %17 : vector<8x2xi32>
    %19 = vector.shape_cast %16 : vector<8x1xf32> to vector<8x1xf32>
    %20 = vector.broadcast %19 : vector<8x1xf32> to vector<8x2xf32>
    %21 = arith.select %18, %20, %11 : vector<8x2xi1>, vector<8x2xf32>
    %22 = vector.extract_strided_slice %9 {offsets = [1, 0], sizes = [1, 512], strides = [1, 1]} : vector<2x512xf32> to vector<1x512xf32>
    %23 = vector.broadcast %22 : vector<1x512xf32> to vector<8x512xf32>
    %24 = arith.mulf %8, %23 : vector<8x512xf32>
    %cst_10 = arith.constant dense<0.000000e+00> : vector<8xf32>
    %25 = vector.multi_reduction <add>, %24, %cst_10 [1] : vector<8x512xf32> to vector<8xf32>
    %26 = vector.shape_cast %25 : vector<8xf32> to vector<8x1xf32>
    %c1_i32 = arith.constant 1 : i32
    %27 = vector.broadcast %c1_i32 : i32 to vector<8x2xi32>
    %28 = arith.cmpi eq, %10, %27 : vector<8x2xi32>
    %29 = vector.shape_cast %26 : vector<8x1xf32> to vector<8x1xf32>
    %30 = vector.broadcast %29 : vector<8x1xf32> to vector<8x2xf32>
    %31 = arith.select %28, %30, %21 : vector<8x2xi1>, vector<8x2xf32>
    %c0_11 = arith.constant 0 : index
    %c0_12 = arith.constant 0 : index
    %32 = vector.load %arg5[%c0_11, %c0_12] : memref<1x2xf32, #tpu.memory_space<vmem>>, vector<1x2xf32>
    %33 = vector.broadcast %32 : vector<1x2xf32> to vector<8x2xf32>
    %34 = arith.addf %31, %33 : vector<8x2xf32>
    %c0_13 = arith.constant 0 : index
    %c0_14 = arith.constant 0 : index
    %35 = vector.load %arg6[%c0_13, %c0_14] : memref<8x2xf32, #tpu.memory_space<vmem>>, vector<8x2xf32>
    tpu.vector_store %arg6[%c0_13, %c0_14], %34 {strides = array<i32>} : memref<8x2xf32, #tpu.memory_space<vmem>>, vector<8x2xf32>,
    return
  }
  func.func @transform_0(%arg0: i32) -> (i32, i32) {
    %c0_i32 = arith.constant 0 : i32
    %c0_i32_0 = arith.constant 0 : i32
    return %arg0, %c0_i32 : i32, i32
  }
  func.func @transform_1(%arg0: i32) -> (i32, i32) {
    %c0_i32 = arith.constant 0 : i32
    %c0_i32_0 = arith.constant 0 : i32
    %c0_i32_1 = arith.constant 0 : i32
    return %c0_i32, %c0_i32_0 : i32, i32
  }
  func.func @transform_2(%arg0: i32) -> (i32, i32) {
    %c0_i32 = arith.constant 0 : i32
    %c0_i32_0 = arith.constant 0 : i32
    %c0_i32_1 = arith.constant 0 : i32
    return %c0_i32, %c0_i32_0 : i32, i32
  }
  func.func @transform_3(%arg0: i32) -> (i32, i32) {
    %c0_i32 = arith.constant 0 : i32
    %c0_i32_0 = arith.constant 0 : i32
    %c0_i32_1 = arith.constant 0 : i32
    return %c0_i32, %c0_i32_0 : i32, i32
  }
  func.func @transform_4(%arg0: i32) -> (i32, i32) {
    %c0_i32 = arith.constant 0 : i32
    %c0_i32_0 = arith.constant 0 : i32
    %c0_i32_1 = arith.constant 0 : i32
    return %c0_i32, %c0_i32_0 : i32, i32
  }
  func.func @transform_5(%arg0: i32) -> (i32, i32) {
    %c0_i32 = arith.constant 0 : i32
    %c0_i32_0 = arith.constant 0 : i32
    return %arg0, %c0_i32 : i32, i32
  }
}

</mosaic_0001>

<bundles_post_ra>
// kernel: tpu_custom_call.1
= control target key start
LH: loop header
LB: loop body
LE: loop exit
PB: predicated region body
PF: predicated region fallthrough
CT: control target
= control target key end

     0   :  { %10 = vsyncpa [#allocation3], 0  ;;  %s516_s0 = inlined_call_operand.hbm [shape: f32[8,32], index: 0, kind: input, shape index: {}]   ;;  %s517_s1 = inlined_call_operand.hbm [shape: bf16[32,512], index: 1, kind: input, shape index: {}]   ;;  %s518_s2 = inlined_call_operand.hbm [shape: f32[1,512], index: 2, kind: input, shape index: {}]   ;;  %s519_s3 = inlined_call_operand.vmem [shape: f32[2,512], index: 3, kind: input, shape index: {}]   ;;  %s520_s4 = inlined_call_operand.vmem [shape: f32[1,2], index: 4, kind: input, shape index: {}]   ;;  %s521_s5 = inlined_call_operand.vmem [shape: f32[8,2], index: 5, kind: output, shape index: {}]  }
   0x1   :  { %11 = vsyncpa [#allocation5], 0  ;;  %s433_s18 = smov [#allocation4]   ;;  %s363_s22 = scalar_lea.hbm %s517_s1, 1024 }
   0x2   :  { %s27_s19 = sshll.u32 %s433_s18, 4  ;;  %p364_p0 = scmp.ne.s32.totalorder %s517_s1, %s363_s22  ;;  %s28_s19 = int_to_ptr.vmem [resolvable:$true] %s27_s19 }
   0x3   :  { %p367_p1 = scmp.lt.u32.totalorder %s363_s22, %s517_s1 }
   0x5   :  { %p369_p2 = pnand %p367_p1, %p364_p0 }
   0x7   :  { %372 = shalt.err (!%p369_p2)
}
   0x8   :  { %s373_s27 = scalar_lea.vmem %s28_s19, 1024  ;;  %p378_p4 = scmp.lt.s32.totalorder %s28_s19, %s28_s19 }
   0x9   :  { %p374_p3 = scmp.ne.s32.totalorder %s28_s19, %s373_s27  ;;  %p379_p5 = scmp.lt.s32.totalorder %s373_s27, %s373_s27 }
   0xb   :  { %p380_p6 = por %p379_p5, %p378_p4 }
   0xd   :  { %p381_p7 = pnand %p380_p6, %p374_p3 }
   0xf   :  { %384 = shalt.err (!%p381_p7)
}
  0x10   :  { %s434_s28 = smov 256   ;;  %s435_s29 = smov 16  }
  0x11   :  { %33 = dma.hbm_to_vmem [thread:$0]  %s517_s1, 1024, %s28_s19, [#allocation5], %s434_s28, %s434_s28, %s435_s29  }
  0x12   :  { %s436_s7 = smov [#allocation2]   ;;  %s437_s9 = smov [#allocation6]  }
  0x13   :  { %s18_s8 = sshll.u32 %s436_s7, 4  ;;  %s40_s10 = sshll.u32 %s437_s9, 4  ;;  %s19_s8 = int_to_ptr.vmem [resolvable:$true] %s18_s8  ;;  %s41_s10 = int_to_ptr.vmem [resolvable:$true] %s40_s10 }
  0x14   :  { %s385_s13 = scalar_lea.hbm %s516_s0, 128 }
  0x15   :  { %p386_p8 = scmp.ne.s32.totalorder %s516_s0, %s385_s13  ;;  %p389_p9 = scmp.lt.u32.totalorder %s385_s13, %s516_s0 }
  0x17   :  { %p391_p10 = pnand %p389_p9, %p386_p8 }
  0x19   :  { %394 = shalt.err (!%p391_p10)
}
  0x1a   :  { %s395_s1 = scalar_lea.vmem %s19_s8, 128  ;;  %p400_p12 = scmp.lt.s32.totalorder %s19_s8, %s19_s8 }
  0x1b   :  { %p396_p11 = scmp.ne.s32.totalorder %s19_s8, %s395_s1  ;;  %p401_p13 = scmp.lt.s32.totalorder %s395_s1, %s395_s1 }
  0x1d   :  { %p402_p0 = por %p401_p13, %p400_p12 }
  0x1f   :  { %p403_p1 = pnand %p402_p0, %p396_p11 }
  0x21   :  { %406 = shalt.err (!%p403_p1)
}
  0x22   :  { %21 = dma.hbm_to_vmem [thread:$0]  %s516_s0, 128, %s19_s8, [#allocation3]  }
  0x23   :  { %s407_s22 = scalar_lea.hbm %s518_s2, 64 }
  0x24   :  { %p408_p2 = scmp.ne.s32.totalorder %s518_s2, %s407_s22  ;;  %p411_p3 = scmp.lt.u32.totalorder %s407_s22, %s518_s2 }
  0x26   :  { %p413_p4 = pnand %p411_p3, %p408_p2 }
  0x28   :  { %416 = shalt.err (!%p413_p4)
}
  0x29   :  { %s417_s27 = scalar_lea.vmem %s41_s10, 64  ;;  %p422_p6 = scmp.lt.s32.totalorder %s41_s10, %s41_s10 }
  0x2a   :  { %p418_p5 = scmp.ne.s32.totalorder %s41_s10, %s417_s27  ;;  %p423_p7 = scmp.lt.s32.totalorder %s417_s27, %s417_s27 }
  0x2c   :  { %p424_p8 = por %p423_p7, %p422_p6 }
  0x2e   :  { %p425_p9 = pnand %p424_p8, %p418_p5 }
  0x30   :  { %428 = shalt.err (!%p425_p9)
}
  0x31   :  { %43 = dma.hbm_to_vmem [thread:$0]  %s518_s2, 64, %s41_s10, [#allocation5]  }
  0x32   :  { %429 = dma.done.wait [#allocation3], 128  }
  0x33   :  { %430 = vsyncadd [#allocation3], 4294967168 }
  0x34   :  { %431 = dma.done.wait [#allocation5], 1088  }
  0x35   :  { %432 = vsyncadd [#allocation5], 4294966208  ;;  %v438_v0 = vmov 0   ;;  %v351_v1 = vld [vmem:[#allocation4 + $0x4] ss:$16 sps:$4 sm:$0xff]   ;;  %v58_v9 = vld [vmem:[#allocation2] sm:$0xff]  ;;  %v70_v11 = vlaneseq }
  0x36   :  { %166 = vmatprep.mubr.bf16.mxu0 %v438_v0  ;;  %207 = vmatprep.mubr.bf16.mxu1 %v438_v0  ;;  %v353_v2 = vld [vmem:[#allocation4 + $0xc] ss:$16 sps:$4 sm:$0xff]   ;;  %v355_v3 = vld [vmem:[#allocation4] ss:$16 sps:$4 sm:$0xff]   ;;  %v356_v4 = vld [vmem:[#allocation4 + $0x8] ss:$16 sps:$4 sm:$0xff]   ;;  %v59_v10 = vpack.c.bf16 %v58_v9, %v58_v9 }
  0x37   :  { %134 = vmatprep.subr.bf16.mxu0 %v351_v1  ;;  %175 = vmatprep.subr.bf16.mxu1 %v353_v2  ;;  %v357_v5 = vld [vmem:[#allocation4 + $0x24] ss:$16 sps:$4 sm:$0xff]   ;;  %v359_v6 = vld [vmem:[#allocation4 + $0x2c] ss:$16 sps:$4 sm:$0xff]   ;;  %v361_v7 = vld [vmem:[#allocation4 + $0x20] ss:$16 sps:$4 sm:$0xff]  }
  0x38   :  { %135 = vmatpush1.bf16.msra.mxu0 %v355_v3  ;;  %176 = vmatpush1.bf16.msra.mxu1 %v356_v4  ;;  %v362_v8 = vld [vmem:[#allocation4 + $0x28] ss:$16 sps:$4 sm:$0xff]   ;;  %vm130_vm0 = vcmask 261120   ;;  %v71_v12 = vshrl.u32 %v70_v11, 7  ;;  %v68_v18 = vld [vmem:[#allocation6] sm:$0xf] }
  0x39   :  { %136 = vmatprep.subr.bf16.mxu0 %v357_v5  ;;  %177 = vmatprep.subr.bf16.mxu1 %v359_v6  ;;  %v220_v16 = vld [vmem:[%s519_s3] sm:$0xff]  ;;  %v222_v9 = vand.u32 127, %v70_v11  ;;  %vm326_vm3 = vcmask 15360  }
  0x3a   :  { %v76_v13 = vsub.s32 1, %v71_v12  ;;  %v80_v14 = vsub.s32 2, %v71_v12  ;;  %v72_v15 = vsub.s32 0, %v71_v12  ;;  %v84_v17 = vsub.s32 3, %v71_v12 }
  0x3b   :  { %v234_v19 = vsub.s32 4, %v71_v12  ;;  %v281_v20 = vsub.s32 5, %v71_v12  ;;  %v285_v24 = vsub.s32 7, %v71_v12  ;;  %v238_v28 = vsub.s32 6, %v71_v12  ;;  %v344_v12 = vld [vmem:[%s520_s4] ss:$0 sm:$0xff] }
  0x3c   :  { %137 = vmatpush1.bf16.msra.mxu0 %v361_v7  ;;  %178 = vmatpush1.bf16.msra.mxu1 %v362_v8  ;;  %v227_v21 = vrot.slane %v220_v16, %v72_v15  ;;  %v274_v22 = vrot.slane %v220_v16, %v76_v13  ;;  %v231_v23 = vrot.slane %v220_v16, %v80_v14  ;;  %vm269_vm1 = vcmp.eq.s32.totalorder %v222_v9, 0 }
  0x3d   :  { %v73_v25 = vrot.slane %v68_v18, %v72_v15  ;;  %v81_v26 = vrot.slane %v68_v18, %v80_v14  ;;  %v278_v27 = vrot.slane %v220_v16, %v84_v17  ;;  %v235_v29 = vrot.slane %v220_v16, %v234_v19 }
  0x3e   :  { %v282_v30 = vrot.slane %v220_v16, %v281_v20  ;;  %v77_v31 = vrot.slane %v68_v18, %v76_v13  ;;  %v85_v32 = vrot.slane %v68_v18, %v84_v17  ;;  %v247_v34 = vrot.slane %v227_v21, %v72_v15 }
  0x3f   :  { %342 = vmatmul.mubr.msk.bf16.vlgmr.msra.gmra.mrb[0].mxu0 %vm130_vm0, %v59_v10  ;;  %343 = vmatmul.mubr.msk.bf16.vlgmr.msra.gmra.mrb[0].mxu1 %vm130_vm0, %v59_v10  ;;  %v294_v35 = vrot.slane %v274_v22, %v76_v13  ;;  %v251_v37 = vrot.slane %v231_v23, %v72_v15  ;;  %v286_v38 = vrot.slane %v220_v16, %v285_v24  ;;  %vm316_vm2 = vcmp.eq.s32.totalorder %v222_v9, 1 }
  0x40   :  { %v298_v42 = vrot.slane %v278_v27, %v76_v13  ;;  %v239_v44 = vrot.slane %v220_v16, %v238_v28  ;;  %v255_v45 = vrot.slane %v235_v29, %v72_v15  ;;  %v302_v46 = vrot.slane %v282_v30, %v76_v13 }
  0x41   :  { %v306_v56 = vrot.slane %v286_v38, %v76_v13 }
  0x42   :  { %v259_v60 = vrot.slane %v239_v44, %v72_v15 }
 0x112   :  { %v168_v33 = vpop.f32.mrb[0].mxu0  ;;  %v209_v36 = vpop.f32.mrb[0].mxu1 }
 0x113   :  { %v169_v39 = vadd.f32 %v168_v33, %v73_v25  ;;  %v210_v40 = vadd.f32 %v209_v36, %v81_v26  ;;  %v170_v41 = vpop.f32.mrb[1].mxu0  ;;  %v211_v43 = vpop.f32.mrb[1].mxu1 }
 0x114   :  { %v171_v47 = vadd.f32 %v170_v41, %v77_v31  ;;  %v212_v48 = vadd.f32 %v211_v43, %v85_v32  ;;  %v172_v49 = vpop.f32.mrb[2].mxu0  ;;  %v213_v50 = vpop.f32.mrb[2].mxu1 }
 0x115   :  { %v216_v51 = vmax.f32 %v169_v39, 0.0  ;;  %v218_v52 = vmax.f32 %v210_v40, 0.0  ;;  %v173_v53 = vpop.f32.mrb[3].mxu0  ;;  %v214_v54 = vpop.f32.mrb[3].mxu1 }
 0x116   :  { %v217_v55 = vmax.f32 %v171_v47, 0.0  ;;  %v219_v59 = vmax.f32 %v212_v48, 0.0 }
 0x117   :  { %v260_v57 = vmul.f32 %v247_v34, %v216_v51  ;;  %v307_v58 = vmul.f32 %v294_v35, %v216_v51  ;;  %v262_v61 = vmul.f32 %v255_v45, %v218_v52  ;;  %v309_v62 = vmul.f32 %v302_v46, %v218_v52 }
 0x118   :  { %v261_v63 = vmul.f32 %v251_v37, %v217_v55  ;;  %v308_v0 = vmul.f32 %v298_v42, %v217_v55  ;;  %v310_v3 = vmul.f32 %v306_v56, %v219_v59  ;;  %v263_v4 = vmul.f32 %v259_v60, %v219_v59 }
 0x11a   :  { %v311_v1 = vadd.f32 %v308_v0, %v307_v58  ;;  %v264_v2 = vadd.f32 %v261_v63, %v260_v57 }
 0x11c   :  { %v265_v5 = vadd.f32 %v264_v2, %v262_v61  ;;  %v312_v6 = vadd.f32 %v311_v1, %v309_v62 }
 0x11e   :  { %v266_v7 = vadd.f32 %v265_v5, %v263_v4  ;;  %v313_v8 = vadd.f32 %v312_v6, %v310_v3 }
 0x120   :  { %267 = vadd.xlane.f32.xlu0 %v266_v7 }
 0x124   :  { %314 = vadd.xlane.f32.xlu0 %v313_v8 }
 0x1ad   :  { %v268_v10 = vpop.xlane.xlu0 %267 }
 0x1ae   :  { %v270_v13 = vsel %vm269_vm1, %v268_v10, 0.0 }
 0x1b1   :  { %v315_v14 = vpop.xlane.xlu0 %314 }
 0x1b2   :  { %v317_v15 = vsel %vm316_vm2, %v315_v14, %v270_v13 }
 0x1b3   :  { %v325_v16 = vadd.f32 %v344_v12, %v317_v15 }
 0x1b5   :  { %327 = vst.msk [vmem:[%s521_s5] sm:$0xff] %vm326_vm3, %v325_v16 }
 0x1b6   :  { %332 = vsyncpa [#allocation3], 1 }
 0x1b7   :  { %333 = vsyncpa [#allocation5], 1 }

</bundles_post_ra>
